<compile_context>
chip_gen: v5e
topology: v5e:2x2
jax: 0.10.0
libtpu: 0.0.40
codegen_flags: <defaults>
</compile_context>

<pallas_src>
import functools

import jax
import jax.numpy as jnp
from jax.experimental import pallas as pl
from jax.experimental.pallas import tpu as pltpu


# --------------------------------------------------------------------------
# Kernel
# --------------------------------------------------------------------------
def actor_kernel(state_ref, ws_ref, b1_ref, wl_ref, bl_ref,
                 wx_ref, bw1_ref, ww2_ref, bw2_ref, out_ref, *, site):
    s = state_ref[...]                                        # (bb, state_size)

    # Fused: left half = fc1 pre-act, right half = fcw1 state contribution.
    su = jnp.dot(s, ws_ref[...],
                 preferred_element_type=jnp.float32)          # (bb, 2*units)

    # x = sigmoid(fc_last(tanh(fc1(...))))
    # wl_p has zero rows for the right half, so the tanh of the right half
    # contributes nothing (cheap EUP work, no lane slicing needed).
    xh = jnp.tanh(su + b1_ref[...])                           # (bb, 2*units)
    x = jax.nn.sigmoid(
        jnp.dot(xh, wl_ref[...], preferred_element_type=jnp.float32)
        + bl_ref[...])                                        # (bb, action_size)

    # fcw1 pre-activation lives in lanes [units:2*units) of hw; the left half
    # is garbage that gets killed by ww2_p's zero rows.
    hw = su + jnp.dot(x, wx_ref[...],
                      preferred_element_type=jnp.float32) + bw1_ref[...]
    awh = jnp.tanh(hw)                                        # (bb, 2*units)

    # fcw2 output placed directly into lanes [4*site:5*site).
    aw = jax.nn.sigmoid(
        jnp.dot(awh, ww2_ref[...], preferred_element_type=jnp.float32)
        + bw2_ref[...])                                       # (bb, action_size)

    # act = cat([x[:, :4*site], aw], 1)  ->  single vselect on lane index.
    lane = jax.lax.broadcasted_iota(jnp.int32, x.shape, 1)
    out_ref[...] = jnp.where(lane < 4 * site, x, aw)


# --------------------------------------------------------------------------
# Wrapper
# --------------------------------------------------------------------------
def actor_forward(state, packed, *, site=4, block_b=1024):
    B, state_size = state.shape
    action_size = packed["wl_p"].shape[1]

    bb = min(B, block_b)
    grid = (pl.cdiv(B, bb),)

    args = (state,
            packed["ws"], packed["b1p"],
            packed["wl_p"], packed["bl"],
            packed["wx_p"], packed["bw1p"],
            packed["ww2_p"], packed["bw2p"])

    # Weights/biases: full-array blocks, constant index_map -> VMEM-resident
    # across all grid steps.
    weight_specs = [pl.BlockSpec(a.shape, lambda i: (0, 0)) for a in args[1:]]
    in_specs = [pl.BlockSpec((bb, state_size), lambda i: (i, 0))] + weight_specs

    # TODO(synk): if profiling at very large B shows the store slot binding,
    # emit a lane-dense (bb, 128) output block and slice in the wrapper.
    return pl.pallas_call(
        functools.partial(actor_kernel, site=site),
        out_shape=jax.ShapeDtypeStruct((B, action_size), jnp.float32),
        grid=grid,
        in_specs=in_specs,
        out_specs=pl.BlockSpec((bb, action_size), lambda i: (i, 0)),
        compiler_params=pltpu.CompilerParams(
            dimension_semantics=("parallel",)),
    )(*args)


# --------------------------------------------------------------------------
# Parameter construction / packing
# --------------------------------------------------------------------------
def init_linear(key, fan_in, fan_out):
    # PyTorch nn.Linear default init: U(-1/sqrt(fan_in), 1/sqrt(fan_in)).
    kw, kb = jax.random.split(key)
    bound = 1.0 / jnp.sqrt(jnp.float32(fan_in))
    w = jax.random.uniform(kw, (fan_in, fan_out), jnp.float32, -bound, bound)
    b = jax.random.uniform(kb, (1, fan_out), jnp.float32, -bound, bound)
    return w, b


def make_params(key, state_size, action_size, units, site):
    k1, k2, k3, k4 = jax.random.split(key, 4)
    w1, b1 = init_linear(k1, state_size - site, units)        # fc1
    wl, bl = init_linear(k2, units, action_size)              # fc_last
    ww1, bw1 = init_linear(k3, 2 * site, units)               # fcw1
    ww2, bw2 = init_linear(k4, units, site)                   # fcw2
    return dict(w1=w1, b1=b1, wl=wl, bl=bl,
                ww1=ww1, bw1=bw1, ww2=ww2, bw2=bw2)


def pack_params(params, *, site, units, state_size, action_size):
    """Zero-pad / re-layout weights once so the kernel needs no lane slicing."""
    f32 = jnp.float32
    w1, b1 = params["w1"], params["b1"]
    wl, bl = params["wl"], params["bl"]
    ww1, bw1 = params["ww1"], params["bw1"]
    ww2, bw2 = params["ww2"], params["bw2"]

    # Fused s-matmul weight: left half fc1 (tail rows zero), right half fcw1's
    # state contribution (head rows zero).
    ws = jnp.zeros((state_size, 2 * units), f32)
    ws = ws.at[: 6 * site + 1, :units].set(w1)
    ws = ws.at[6 * site + 1:, units:].set(ww1[:site, :])

    b1p = jnp.zeros((1, 2 * units), f32).at[:, :units].set(b1)

    # fc_last padded to consume the 2*units-wide tanh (right half rows zero).
    wl_p = jnp.zeros((2 * units, action_size), f32).at[:units, :].set(wl)

    # fcw1's x contribution, output placed into lanes [units:2*units).
    wx_p = jnp.zeros((action_size, 2 * units), f32)
    wx_p = wx_p.at[4 * site:, units:].set(ww1[site:, :])
    bw1p = jnp.zeros((1, 2 * units), f32).at[:, units:].set(bw1)

    # fcw2 consuming the 2*units-wide tanh, output placed into
    # lanes [4*site:5*site) of an action_size-wide result.
    ww2_p = jnp.zeros((2 * units, action_size), f32)
    ww2_p = ww2_p.at[units:, 4 * site:].set(ww2)
    bw2p = jnp.zeros((1, action_size), f32).at[:, 4 * site:].set(bw2)

    return dict(ws=ws, b1p=b1p, wl_p=wl_p, bl=bl,
                wx_p=wx_p, bw1p=bw1p, ww2_p=ww2_p, bw2p=bw2p)


# --------------------------------------------------------------------------
# Pure-JAX reference (mirrors the PyTorch forward, layer=1)
# --------------------------------------------------------------------------
def actor_reference(state, params, *, site=4):
    x = jnp.tanh(state[:, : 6 * site + 1] @ params["w1"] + params["b1"])
    x = jax.nn.sigmoid(x @ params["wl"] + params["bl"])
    aw = jnp.concatenate([state[:, 6 * site + 1:], x[:, 4 * site:]], axis=1)
    aw = jnp.tanh(aw @ params["ww1"] + params["bw1"])
    aw = jax.nn.sigmoid(aw @ params["ww2"] + params["bw2"])
    return jnp.concatenate([x[:, : 4 * site], aw], axis=1)


if __name__ == "__main__":
    site = 4
    state_size = 7 * site + 1          # 29
    action_size = 5 * site             # 20
    units = 32
    batch = 2

    key = jax.random.PRNGKey(0)
    k_state, k_params, k_big = jax.random.split(key, 3)
    state = jax.random.normal(k_state, (batch, state_size), jnp.float32)
    params = make_params(k_params, state_size, action_size, units, site)
    packed = pack_params(params, site=site, units=units,
                         state_size=state_size, action_size=action_size)

    # Small-batch run (matches the module's typical per-step call).
    out = actor_forward(state, packed, site=site)
    out = jax.block_until_ready(out)
    ref = actor_reference(state, params, site=site)
    assert out.shape == (batch, action_size)
    assert jnp.allclose(out, ref, atol=3e-5, rtol=1e-5), "mismatch (B=2)"

    # Batched / gridded run: weights stay VMEM-resident across grid steps.
    big_b = 256
    state_big = jax.random.normal(k_big, (big_b, state_size), jnp.float32)
    out_big = actor_forward(state_big, packed, site=site, block_b=128)
    out_big = jax.block_until_ready(out_big)
    ref_big = actor_reference(state_big, params, site=site)
    assert out_big.shape == (big_b, action_size)
    assert jnp.allclose(out_big, ref_big, atol=3e-5, rtol=1e-5), "mismatch (B=256)"

    print("KERNEL_OK")
</pallas_src>

<mosaic_0001>
module attributes {stable_mosaic.version = 11 : i64} {
  func.func @actor_kernel(%arg0: i32, %arg1: memref<2x29xf32, #tpu.memory_space<vmem>>, %arg2: memref<29x64xf32, #tpu.memory_space<vmem>>, %arg3: memref<1x64xf32, #tpu.memory_space<vmem>>, %arg4: memref<64x20xf32, #tpu.memory_space<vmem>>, %arg5: memref<1x20xf32, #tpu.memory_space<vmem>>, %arg6: memref<20x64xf32, #tpu.memory_space<vmem>>, %arg7: memref<1x64xf32, #tpu.memory_space<vmem>>, %arg8: memref<64x20xf32, #tpu.memory_space<vmem>>, %arg9: memref<1x20xf32, #tpu.memory_space<vmem>>, %arg10: memref<2x20xf32, #tpu.memory_space<vmem>>) attributes {dimension_semantics = [#tpu.dimension_semantics<parallel>], iteration_bounds = array<i64: 1>, scalar_prefetch = 0 : i64, scratch_operands = 0 : i64, tpu.core_type = #tpu.core_type<tc>, window_params = [{transform_indices = @transform_0, window_bounds = array<i64: 2, 29>}, {pipeline_mode = #tpu.pipeline_mode<synchronous>, transform_indices = @transform_1, window_bounds = array<i64: 29, 64>}, {pipeline_mode = #tpu.pipeline_mode<synchronous>, transform_indices = @transform_2, window_bounds = array<i64: 1, 64>}, {pipeline_mode = #tpu.pipeline_mode<synchronous>, transform_indices = @transform_3, window_bounds = array<i64: 64, 20>}, {pipeline_mode = #tpu.pipeline_mode<synchronous>, transform_indices = @transform_4, window_bounds = array<i64: 1, 20>}, {pipeline_mode = #tpu.pipeline_mode<synchronous>, transform_indices = @transform_5, window_bounds = array<i64: 20, 64>}, {pipeline_mode = #tpu.pipeline_mode<synchronous>, transform_indices = @transform_6, window_bounds = array<i64: 1, 64>}, {pipeline_mode = #tpu.pipeline_mode<synchronous>, transform_indices = @transform_7, window_bounds = array<i64: 64, 20>}, {pipeline_mode = #tpu.pipeline_mode<synchronous>, transform_indices = @transform_8, window_bounds = array<i64: 1, 20>}, {transform_indices = @transform_9, window_bounds = array<i64: 2, 20>}]} {
    %c0 = arith.constant 0 : index
    %c0_0 = arith.constant 0 : index
    %0 = vector.load %arg1[%c0, %c0_0] : memref<2x29xf32, #tpu.memory_space<vmem>>, vector<2x29xf32>
    %c0_1 = arith.constant 0 : index
    %c0_2 = arith.constant 0 : index
    %1 = vector.load %arg2[%c0_1, %c0_2] : memref<29x64xf32, #tpu.memory_space<vmem>>, vector<29x64xf32>
    %cst = arith.constant dense<0.000000e+00> : vector<2x64xf32>
    %2 = tpu.matmul %0, %1, %cst {dimension_numbers = #tpu.dot_dimension_numbers<[1], [0], [0], [1], [0, 0, 1, 1], [], []>} : vector<2x29xf32>, vector<29x64xf32>, vector<2x64xf32> -> vector<2x64xf32>
    %c0_3 = arith.constant 0 : index
    %c0_4 = arith.constant 0 : index
    %3 = vector.load %arg3[%c0_3, %c0_4] : memref<1x64xf32, #tpu.memory_space<vmem>>, vector<1x64xf32>
    %4 = vector.broadcast %3 : vector<1x64xf32> to vector<2x64xf32>
    %5 = arith.addf %2, %4 : vector<2x64xf32>
    %6 = math.tanh %5 : vector<2x64xf32>
    %c0_5 = arith.constant 0 : index
    %c0_6 = arith.constant 0 : index
    %7 = vector.load %arg4[%c0_5, %c0_6] : memref<64x20xf32, #tpu.memory_space<vmem>>, vector<64x20xf32>
    %cst_7 = arith.constant dense<0.000000e+00> : vector<2x20xf32>
    %8 = tpu.matmul %6, %7, %cst_7 {dimension_numbers = #tpu.dot_dimension_numbers<[1], [0], [0], [1], [0, 0, 1, 1], [], []>} : vector<2x64xf32>, vector<64x20xf32>, vector<2x20xf32> -> vector<2x20xf32>
    %c0_8 = arith.constant 0 : index
    %c0_9 = arith.constant 0 : index
    %9 = vector.load %arg5[%c0_8, %c0_9] : memref<1x20xf32, #tpu.memory_space<vmem>>, vector<1x20xf32>
    %10 = vector.broadcast %9 : vector<1x20xf32> to vector<2x20xf32>
    %11 = arith.addf %8, %10 : vector<2x20xf32>
    %12 = arith.negf %11 : vector<2x20xf32>
    %13 = math.exp %12 : vector<2x20xf32>
    %cst_10 = arith.constant 1.000000e+00 : f32
    %14 = vector.broadcast %cst_10 : f32 to vector<2x20xf32>
    %15 = arith.addf %14, %13 : vector<2x20xf32>
    %16 = arith.divf %14, %15 : vector<2x20xf32>
    %c0_11 = arith.constant 0 : index
    %c0_12 = arith.constant 0 : index
    %17 = vector.load %arg6[%c0_11, %c0_12] : memref<20x64xf32, #tpu.memory_space<vmem>>, vector<20x64xf32>
    %cst_13 = arith.constant dense<0.000000e+00> : vector<2x64xf32>
    %18 = tpu.matmul %16, %17, %cst_13 {dimension_numbers = #tpu.dot_dimension_numbers<[1], [0], [0], [1], [0, 0, 1, 1], [], []>} : vector<2x20xf32>, vector<20x64xf32>, vector<2x64xf32> -> vector<2x64xf32>
    %19 = arith.addf %2, %18 : vector<2x64xf32>
    %c0_14 = arith.constant 0 : index
    %c0_15 = arith.constant 0 : index
    %20 = vector.load %arg7[%c0_14, %c0_15] : memref<1x64xf32, #tpu.memory_space<vmem>>, vector<1x64xf32>
    %21 = vector.broadcast %20 : vector<1x64xf32> to vector<2x64xf32>
    %22 = arith.addf %19, %21 : vector<2x64xf32>
    %23 = math.tanh %22 : vector<2x64xf32>
    %c0_16 = arith.constant 0 : index
    %c0_17 = arith.constant 0 : index
    %24 = vector.load %arg8[%c0_16, %c0_17] : memref<64x20xf32, #tpu.memory_space<vmem>>, vector<64x20xf32>
    %cst_18 = arith.constant dense<0.000000e+00> : vector<2x20xf32>
    %25 = tpu.matmul %23, %24, %cst_18 {dimension_numbers = #tpu.dot_dimension_numbers<[1], [0], [0], [1], [0, 0, 1, 1], [], []>} : vector<2x64xf32>, vector<64x20xf32>, vector<2x20xf32> -> vector<2x20xf32>
    %c0_19 = arith.constant 0 : index
    %c0_20 = arith.constant 0 : index
    %26 = vector.load %arg9[%c0_19, %c0_20] : memref<1x20xf32, #tpu.memory_space<vmem>>, vector<1x20xf32>
    %27 = vector.broadcast %26 : vector<1x20xf32> to vector<2x20xf32>
    %28 = arith.addf %25, %27 : vector<2x20xf32>
    %29 = arith.negf %28 : vector<2x20xf32>
    %30 = math.exp %29 : vector<2x20xf32>
    %cst_21 = arith.constant 1.000000e+00 : f32
    %31 = vector.broadcast %cst_21 : f32 to vector<2x20xf32>
    %32 = arith.addf %31, %30 : vector<2x20xf32>
    %33 = arith.divf %31, %32 : vector<2x20xf32>
    %34 = tpu.iota {dimensions = array<i32: 1>} : vector<2x20xi32>
    %c16_i32 = arith.constant 16 : i32
    %35 = vector.broadcast %c16_i32 : i32 to vector<2x20xi32>
    %36 = arith.cmpi slt, %34, %35 : vector<2x20xi32>
    %37 = arith.select %36, %16, %33 : vector<2x20xi1>, vector<2x20xf32>
    %c0_22 = arith.constant 0 : index
    %c0_23 = arith.constant 0 : index
    %38 = vector.load %arg10[%c0_22, %c0_23] : memref<2x20xf32, #tpu.memory_space<vmem>>, vector<2x20xf32>
    tpu.vector_store %arg10[%c0_22, %c0_23], %37 {strides = array<i32>} : memref<2x20xf32, #tpu.memory_space<vmem>>, vector<2x20xf32>,
    return
  }
  func.func @transform_0(%arg0: i32) -> (i32, i32) {
    %c0_i32 = arith.constant 0 : i32
    %c0_i32_0 = arith.constant 0 : i32
    return %arg0, %c0_i32 : i32, i32
  }
  func.func @transform_1(%arg0: i32) -> (i32, i32) {
    %c0_i32 = arith.constant 0 : i32
    %c0_i32_0 = arith.constant 0 : i32
    %c0_i32_1 = arith.constant 0 : i32
    return %c0_i32, %c0_i32_0 : i32, i32
  }
  func.func @transform_2(%arg0: i32) -> (i32, i32) {
    %c0_i32 = arith.constant 0 : i32
    %c0_i32_0 = arith.constant 0 : i32
    %c0_i32_1 = arith.constant 0 : i32
    return %c0_i32, %c0_i32_0 : i32, i32
  }
  func.func @transform_3(%arg0: i32) -> (i32, i32) {
    %c0_i32 = arith.constant 0 : i32
    %c0_i32_0 = arith.constant 0 : i32
    %c0_i32_1 = arith.constant 0 : i32
    return %c0_i32, %c0_i32_0 : i32, i32
  }
  func.func @transform_4(%arg0: i32) -> (i32, i32) {
    %c0_i32 = arith.constant 0 : i32
    %c0_i32_0 = arith.constant 0 : i32
    %c0_i32_1 = arith.constant 0 : i32
    return %c0_i32, %c0_i32_0 : i32, i32
  }
  func.func @transform_5(%arg0: i32) -> (i32, i32) {
    %c0_i32 = arith.constant 0 : i32
    %c0_i32_0 = arith.constant 0 : i32
    %c0_i32_1 = arith.constant 0 : i32
    return %c0_i32, %c0_i32_0 : i32, i32
  }
  func.func @transform_6(%arg0: i32) -> (i32, i32) {
    %c0_i32 = arith.constant 0 : i32
    %c0_i32_0 = arith.constant 0 : i32
    %c0_i32_1 = arith.constant 0 : i32
    return %c0_i32, %c0_i32_0 : i32, i32
  }
  func.func @transform_7(%arg0: i32) -> (i32, i32) {
    %c0_i32 = arith.constant 0 : i32
    %c0_i32_0 = arith.constant 0 : i32
    %c0_i32_1 = arith.constant 0 : i32
    return %c0_i32, %c0_i32_0 : i32, i32
  }
  func.func @transform_8(%arg0: i32) -> (i32, i32) {
    %c0_i32 = arith.constant 0 : i32
    %c0_i32_0 = arith.constant 0 : i32
    %c0_i32_1 = arith.constant 0 : i32
    return %c0_i32, %c0_i32_0 : i32, i32
  }
  func.func @transform_9(%arg0: i32) -> (i32, i32) {
    %c0_i32 = arith.constant 0 : i32
    %c0_i32_0 = arith.constant 0 : i32
    return %arg0, %c0_i32 : i32, i32
  }
}

</mosaic_0001>

<bundles_post_ra>
// kernel: tpu_custom_call.1
= control target key start
LH: loop header
LB: loop body
LE: loop exit
PB: predicated region body
PF: predicated region fallthrough
CT: control target
= control target key end

     0   :  { %vm42_vm0 = vcmask 1044480   ;;  %s432_s0 = inlined_call_operand.vmem [shape: f32[2,29], index: 0, kind: input, shape index: {}]   ;;  %s433_s1 = inlined_call_operand.vmem [shape: f32[29,64], index: 1, kind: input, shape index: {}]   ;;  %s434_s2 = inlined_call_operand.vmem [shape: f32[1,64], index: 2, kind: input, shape index: {}]   ;;  %s435_s3 = inlined_call_operand.vmem [shape: f32[64,20], index: 3, kind: input, shape index: {}]   ;;  %s436_s4 = inlined_call_operand.vmem [shape: f32[1,20], index: 4, kind: input, shape index: {}]   ;;  %s437_s5 = inlined_call_operand.vmem [shape: f32[20,64], index: 5, kind: input, shape index: {}]   ;;  %s438_s6 = inlined_call_operand.vmem [shape: f32[1,64], index: 6, kind: input, shape index: {}]   ;;  %s439_s7 = inlined_call_operand.vmem [shape: f32[64,20], index: 7, kind: input, shape index: {}]   ;;  %s440_s8 = inlined_call_operand.vmem [shape: f32[1,20], index: 8, kind: input, shape index: {}]   ;;  %s441_s9 = inlined_call_operand.hbm [shape: f32[2,20], index: 9, kind: output, shape index: {}]  }
   0x1   :  { %v37_v0 = vld [vmem:[%s433_s1 + $0x18] sm:$0x1f]  ;;  %v36_v1 = vld [vmem:[%s433_s1 + $0x10] sm:$0xff]  ;;  %v35_v2 = vld [vmem:[%s433_s1 + $0x8] sm:$0xff] }
   0x2   :  { %241 = vmatpush.msk.msra.mxu0 %vm42_vm0, %v37_v0  ;;  %v79_v3 = vld [vmem:[%s435_s3 + $0x38] sm:$0xff]  ;;  %v78_v4 = vld [vmem:[%s435_s3 + $0x30] sm:$0xff]  ;;  %v77_v5 = vld [vmem:[%s435_s3 + $0x28] sm:$0xff] }
   0x3   :  { %96 = vmatpush.msra.mxu1 %v79_v3  ;;  %v34_v6 = vld [vmem:[%s433_s1] sm:$0xff] }
   0x4   :  { %59 = vmatpush.msra.mxu0 %v36_v1 }
   0x5   :  { %97 = vmatpush.msra.mxu1 %v78_v4 }
   0x6   :  { %14 = vsyncpa [#allocation3], 0  ;;  %60 = vmatpush.msra.mxu0 %v35_v2  ;;  %v33_v7 = vld [vmem:[%s432_s0] sm:$0x3]  ;;  %vm38_vm1 = vcmask 236544   ;;  %v75_v9 = vld [vmem:[%s435_s3 + $0x18] sm:$0xff]  ;;  %v219_v56 = vlaneseq }
   0x7   :  { %98 = vmatpush.msra.mxu1 %v77_v5  ;;  %v76_v8 = vld [vmem:[%s435_s3 + $0x20] sm:$0xff]  ;;  %v74_v10 = vld [vmem:[%s435_s3 + $0x10] sm:$0xff]  ;;  %v73_v11 = vld [vmem:[%s435_s3 + $0x8] sm:$0xff]  ;;  %vm84_vm2 = vcmask 523264   ;;  %vm134_vm3 = vcmask 1043456   ;;  %vm130_vm7 = vcmask 162816  }
   0x8   :  { %61 = vmatpush.msra.mxu0 %v34_v6  ;;  %v72_v12 = vld [vmem:[%s435_s3] sm:$0xff]  ;;  %v129_v17 = vld [vmem:[%s437_s5 + $0x10] sm:$0xf]  ;;  %v128_v18 = vld [vmem:[%s437_s5 + $0x8] sm:$0xff]  ;;  %v220_v60 = vand.u32 127, %v219_v56  ;;  %s232_s16 = sshll.u32 %s441_s9, 4  ;;  %s233_s16 = int_to_ptr.hbm [resolvable:$true] %s232_s16 }
   0x9   :  { %242 = vmatmul.msk.f32.vlgmr.msra.gmra.mxu0 %vm38_vm1, %v33_v7  ;;  %99 = vmatpush.msra.mxu1 %v76_v8  ;;  %v250_v13 = vld [vmem:[%s434_s2] ss:$0 sm:$0xff]  ;;  %v172_v21 = vld [vmem:[%s439_s7 + $0x38] sm:$0xff]  ;;  %v171_v22 = vld [vmem:[%s439_s7 + $0x30] sm:$0xff]  ;;  %vm223_vm14 = vcmask 156672  }
   0xa   :  { %245 = vmatpush.msk.msra.mxu2 %vm134_vm3, %v129_v17  ;;  %v127_v19 = vld [vmem:[%s437_s5] sm:$0xff]  ;;  %188 = vmatpush.msra.mxu3 %v172_v21  ;;  %v170_v38 = vld [vmem:[%s439_s7 + $0x28] sm:$0xff]  ;;  %v168_v40 = vld [vmem:[%s439_s7 + $0x18] sm:$0xff]  ;;  %vm221_vm12 = vcmp.lt.s32.totalorder %v220_v60, 16 }
   0xb   :  { %100 = vmatpush.msra.mxu1 %v75_v9  ;;  %v251_v20 = vld [vmem:[%s436_s4] ss:$0 sm:$0xff]  ;;  %v167_v41 = vld [vmem:[%s439_s7 + $0x10] sm:$0xff]  ;;  %v166_v42 = vld [vmem:[%s439_s7 + $0x8] sm:$0xff] }
   0xc   :  { %152 = vmatpush.msra.mxu2 %v128_v18  ;;  %189 = vmatpush.msra.mxu3 %v171_v22  ;;  %v169_v39 = vld [vmem:[%s439_s7 + $0x20] sm:$0xff] }
   0xd   :  { %101 = vmatpush.msra.mxu1 %v74_v10  ;;  %v165_v43 = vld [vmem:[%s439_s7] sm:$0xff] }
   0xe   :  { %153 = vmatpush.msra.mxu2 %v127_v19  ;;  %190 = vmatpush.msra.mxu3 %v170_v38  ;;  %v252_v44 = vld [vmem:[%s438_s6] ss:$0 sm:$0xff]  ;;  %s292_s6 = smov [#allocation2]  }
   0xf   :  { %102 = vmatpush.msra.mxu1 %v73_v11  ;;  %v253_v49 = vld [vmem:[%s440_s8] ss:$0 sm:$0xff]  ;;  %s230_s7 = sshll.u32 %s292_s6, 4  ;;  %s231_s7 = int_to_ptr.vmem [resolvable:$true] %s230_s7 }
  0x10   :  { %191 = vmatpush.msra.mxu3 %v169_v39 }
  0x11   :  { %103 = vmatpush.msra.mxu1 %v72_v12 }
  0x12   :  { %192 = vmatpush.msra.mxu3 %v168_v40 }
  0x14   :  { %193 = vmatpush.msra.mxu3 %v167_v41 }
  0x16   :  { %194 = vmatpush.msra.mxu3 %v166_v42 }
  0x18   :  { %195 = vmatpush.msra.mxu3 %v165_v43 }
  0x86   :  { %v63_v14 = vpop.f32.mrf.mxu0 }
  0x87   :  { %v70_v15 = vadd.f32 %v250_v13, %v63_v14 }
  0x89   :  { %254 = vtanh.f32 %v70_v15 }
  0x8f   :  { %v255_v16 = vpop.eup %254 }
  0x90   :  { %243 = vmatmul.msk.f32.vlgmr.msra.gmra.mxu1 %vm84_vm2, %v255_v16 }
 0x10d   :  { %v105_v23 = vpop.f32.mrf.mxu1 }
 0x10e   :  { %v106_v24 = vadd.f32 %v251_v20, %v105_v23 }
 0x110   :  { %v244_v25 = vmul.f32 -1.442695, %v106_v24 }
 0x112   :  { %256 = vpow2.f32 %v244_v25 }
 0x118   :  { %v257_v26 = vpop.eup %256 }
 0x119   :  { %v111_v27 = vadd.f32 1.0, %v257_v26 }
 0x11b   :  { %258 = vrcp.f32 %v111_v27  ;;  %v123_v31 = vand.u32 2147483648, %v111_v27  ;;  %v121_v33 = vand.u32 2147483647, %v111_v27  ;;  %vm117_vm5 = vweird.f32 %v111_v27 }
 0x11d   :  { %v124_v35 = vor.u32 1.1754944e-38, %v123_v31  ;;  %vm122_vm8 = vcmp.eq.f32.partialorder %v121_v33, 8.507059e+37 }
 0x121   :  { %v259_v28 = vpop.eup %258 }
 0x122   :  { %v113_v29 = vmul.f32 %v259_v28, %v111_v27  ;;  %vm118_vm4 = vweird.f32 %v259_v28 }
 0x123   :  { %vm119_vm6 = vmor %vm117_vm5, %vm118_vm4 }
 0x124   :  { %v114_v30 = vsub.f32 1.0, %v113_v29 }
 0x126   :  { %v115_v32 = vmul.f32 %v259_v28, %v114_v30 }
 0x128   :  { %v116_v34 = vadd.f32 %v259_v28, %v115_v32 }
 0x12a   :  { %v120_v36 = vsel %vm119_vm6, %v259_v28, %v116_v34 }
 0x12b   :  { %v125_v37 = vsel %vm122_vm8, %v124_v35, %v120_v36 }
 0x12c   :  { %246 = vmatmul.msk.f32.vlgmr.msra.gmra.mxu2 %vm130_vm7, %v125_v37 }
 0x1af   :  { %v155_v45 = vpop.f32.mrf.mxu2 }
 0x1b0   :  { %v158_v46 = vadd.f32 %v155_v45, %v63_v14 }
 0x1b2   :  { %v163_v47 = vadd.f32 %v252_v44, %v158_v46 }
 0x1b4   :  { %260 = vtanh.f32 %v163_v47 }
 0x1ba   :  { %v261_v48 = vpop.eup %260 }
 0x1bb   :  { %247 = vmatmul.msk.f32.vlgmr.msra.gmra.mxu3 %vm84_vm2, %v261_v48 }
 0x23e   :  { %v197_v50 = vpop.f32.mrf.mxu3 }
 0x23f   :  { %v198_v51 = vadd.f32 %v253_v49, %v197_v50 }
 0x241   :  { %v248_v52 = vmul.f32 -1.442695, %v198_v51 }
 0x243   :  { %262 = vpow2.f32 %v248_v52 }
 0x249   :  { %v263_v53 = vpop.eup %262 }
 0x24a   :  { %v203_v54 = vadd.f32 1.0, %v263_v53 }
 0x24c   :  { %264 = vrcp.f32 %v203_v54  ;;  %v215_v59 = vand.u32 2147483648, %v203_v54  ;;  %v213_v62 = vand.u32 2147483647, %v203_v54  ;;  %vm209_vm10 = vweird.f32 %v203_v54 }
 0x24e   :  { %v216_v0 = vor.u32 1.1754944e-38, %v215_v59  ;;  %vm214_vm13 = vcmp.eq.f32.partialorder %v213_v62, 8.507059e+37 }
 0x252   :  { %v265_v55 = vpop.eup %264 }
 0x253   :  { %v205_v57 = vmul.f32 %v265_v55, %v203_v54  ;;  %vm210_vm9 = vweird.f32 %v265_v55 }
 0x254   :  { %vm211_vm11 = vmor %vm209_vm10, %vm210_vm9 }
 0x255   :  { %v206_v58 = vsub.f32 1.0, %v205_v57 }
 0x257   :  { %v207_v61 = vmul.f32 %v265_v55, %v206_v58 }
 0x259   :  { %v208_v63 = vadd.f32 %v265_v55, %v207_v61 }
 0x25b   :  { %v212_v1 = vsel %vm211_vm11, %v265_v55, %v208_v63 }
 0x25c   :  { %v217_v2 = vsel %vm214_vm13, %v216_v0, %v212_v1 }
 0x25d   :  { %v222_v3 = vsel %vm221_vm12, %v125_v37, %v217_v2 }
 0x25e   :  { %224 = vst.msk [vmem:[#allocation2] sm:$0x3] %vm223_vm14, %v222_v3 }
 0x25f   :  { %235 = dma.vmem_to_hbm [thread:$0]  %s231_s7, 32, %s233_s16, [#allocation3]  }
 0x260   :  { %290 = dma.done.wait [#allocation3], 32  }
 0x261   :  { %291 = vsyncadd [#allocation3], 4294967264 }
 0x262   :  { %240 = vsyncpa [#allocation3], 1 }

</bundles_post_ra>
